<compile_context>
chip_gen: v6e
topology: v6e:2x2x1
jax: 0.10.0
libtpu: 0.0.40
codegen_flags: <defaults>
</compile_context>

<pallas_src>
import jax
import jax.numpy as jnp
from jax import lax
from jax.experimental import pallas as pl
from jax.experimental.pallas import tpu as pltpu

_LANES = 128
_SMOOTH = 1.0


def _chip_hints():
    """(num_tensorcores, max_row_tile) from the local device generation.

    * v7x has 2 TensorCores per chip -> allow the 2-way "parallel" grid split.
    * v5e defaults to 16 MiB scoped VMEM -> keep 1 MiB (2048,128) f32 blocks;
      v6e/v7x default to 32 MiB -> 2 MiB (4096,128) blocks halve the number of
      grid steps and their ~0.35us/step pipeline overhead.
    """
    kind = ""
    try:
        kind = jax.devices()[0].device_kind.lower()
    except Exception:  # no device visible (e.g. interpret mode)
        pass
    two_tc = ("v7" in kind) or ("tpu7" in kind)
    big_tile = two_tc or ("v6" in kind)
    return (2 if two_tc else 1), (4096 if big_tile else 2048)


def _dice_sums(p2d, t2d):
    """[sum(p*t), sum(t*t), sum(p*p)] over two (R, 128) arrays (native dtypes)."""
    R = p2d.shape[0]
    n_tc, row_tile_max = _chip_hints()
    row_tile = min(R, row_tile_max)
    nblocks = pl.cdiv(R, row_tile)
    # Split blocks over TensorCores only on multi-TC chips (v7x); on 1-TC
    # chips the split would only add a duplicated, re-DMAed tail block.
    ncores = n_tc if nblocks >= 2 else 1
    bpc = pl.cdiv(nblocks, ncores)              # blocks per core
    dup_blocks = ncores * bpc != nblocks        # odd split -> one clamped dup block
    ragged_rows = R % row_tile != 0             # last block is partially OOB
    need_mask = dup_blocks or ragged_rows
    # Sublane-deferred accumulator: per-block reduce is plain vreg adds into a
    # (3, sub, 128) slab; the sub->1 / 128->1 reduce happens once, outside.
    sub = 8 if row_tile % 8 == 0 else 1

    def kernel(p_ref, t_ref, out_ref):
        c = pl.program_id(0)
        k = pl.program_id(1)

        @pl.when(k == 0)
        def _init():
            out_ref[...] = jnp.zeros_like(out_ref)

        def fold(x):  # (row_tile, 128) -> (sub, 128); VALU-only when sub == 8
            if sub == 8:
                return jnp.sum(x.reshape(-1, sub, _LANES), axis=0)
            return jnp.sum(x, axis=0, keepdims=True)

        def accumulate(p, t):
            # Single batched RMW of the VMEM-resident output block per step.
            out_ref[0] += jnp.stack([fold(p * t), fold(t * t), fold(p * p)])

        p = p_ref[...].astype(jnp.float32)   # f32 cast happens after the DMA
        t = t_ref[...].astype(jnp.float32)

        if not need_mask:
            accumulate(p, t)
        else:
            # Only the ragged-tail / duplicated steps pay for the mask.
            row_base = (c * bpc + k) * row_tile
            is_full = row_base + row_tile <= R

            @pl.when(is_full)
            def _fast():
                accumulate(p, t)

            @pl.when(jnp.logical_not(is_full))
            def _tail():
                rows = lax.broadcasted_iota(jnp.int32, (row_tile, _LANES), 0)
                valid = rows + row_base < R
                accumulate(jnp.where(valid, p, 0.0), jnp.where(valid, t, 0.0))

    def in_map(c, k):
        # Clamp keeps duplicated tail iterations in bounds (they are fully
        # masked to zero inside the kernel).
        return (jnp.minimum(c * bpc + k, nblocks - 1), 0)

    partials = pl.pallas_call(
        kernel,
        out_shape=jax.ShapeDtypeStruct((ncores, 3, sub, _LANES), jnp.float32),
        grid_spec=pltpu.PrefetchScalarGridSpec(
            num_scalar_prefetch=0,
            grid=(ncores, bpc),
            in_specs=[
                pl.BlockSpec((row_tile, _LANES), in_map),
                pl.BlockSpec((row_tile, _LANES), in_map),
            ],
            out_specs=pl.BlockSpec((1, 3, sub, _LANES), lambda c, k: (c, 0, 0, 0)),
        ),
        compiler_params=pltpu.CompilerParams(
            dimension_semantics=("parallel", "arbitrary"),
            vmem_limit_bytes=40 * 1024 * 1024),
    )(p2d, t2d)

    return jnp.sum(partials, axis=(0, 2, 3))            # (3,) f32


def _prep(x):
    """Flatten, keeping the native dtype for the DMA (f32 cast is in-kernel).

    Only bool is rewritten (to int8, 1 byte/elem); float / int ground-truth
    masks are streamed as-is with no wrapper-side copy.
    """
    if x.dtype == jnp.bool_:
        x = x.astype(jnp.int8)
    return x.reshape(-1)


def ga_loss(mask, gt_mask, k=100000.0):
    """Matches GALoss.forward: returns only the log-cosh dice loss."""
    del k  # softening factor only feeds _qg_soft, which forward never calls
    p = _prep(mask)
    t = _prep(gt_mask)
    n = p.shape[0]
    n_main = (n // _LANES) * _LANES

    if n_main == n:
        # Common case: element count is a multiple of 128 -> no pad / copy.
        sums = _dice_sums(p.reshape(-1, _LANES), t.reshape(-1, _LANES))
    else:
        # Ragged mod 128: kernel reduces the aligned prefix; the <128-element
        # tail is summed in plain JAX (no full-array pad pass).
        sums = jnp.zeros((3,), jnp.float32)
        if n_main:
            sums = _dice_sums(p[:n_main].reshape(-1, _LANES),
                              t[:n_main].reshape(-1, _LANES))
        pt = p[n_main:].astype(jnp.float32)
        tt = t[n_main:].astype(jnp.float32)
        sums = sums + jnp.stack(
            [jnp.sum(pt * tt), jnp.sum(tt * tt), jnp.sum(pt * pt)])

    intersect, y_sum, z_sum = sums[0], sums[1], sums[2]
    loss = (2.0 * intersect + _SMOOTH) / (z_sum + y_sum + _SMOOTH)
    loss = 1.0 - loss
    loss = jnp.log(jnp.cosh(loss))
    return jnp.mean(loss)          # mean of a 0-d tensor, as in the reference


def _ga_loss_ref(mask, gt_mask):
    p = mask.astype(jnp.float32)
    t = gt_mask.astype(jnp.float32)
    intersect = jnp.sum(p * t)
    y_sum = jnp.sum(t * t)
    z_sum = jnp.sum(p * p)
    loss = (2.0 * intersect + _SMOOTH) / (z_sum + y_sum + _SMOOTH)
    return jnp.log(jnp.cosh(1.0 - loss))


def _check(mask, gt_mask):
    out = jax.block_until_ready(ga_loss(mask, gt_mask))
    ref = jax.block_until_ready(_ga_loss_ref(mask, gt_mask))
    assert jnp.allclose(out, ref, rtol=1e-3, atol=1e-5), (out, ref)


if __name__ == "__main__":
    key = jax.random.PRNGKey(0)
    k1, k2, k3, k4, k5, k6 = jax.random.split(key, 6)

    # Typical decision-map shape (NCHW); bool ground truth -> int8 DMA path.
    mask = jax.nn.sigmoid(jax.random.normal(k1, (2, 1, 32, 32), jnp.float32))
    gt_mask = jax.random.uniform(k2, (2, 1, 32, 32)) > 0.5
    _check(mask, gt_mask)

    # Element count not a multiple of 128 -> aligned-prefix kernel + JAX tail.
    mask_r = jax.nn.sigmoid(jax.random.normal(k3, (2, 1, 63, 65), jnp.float32))
    gt_mask_r = (jax.random.uniform(k4, (2, 1, 63, 65)) > 0.5).astype(jnp.float32)
    _check(mask_r, gt_mask_r)

    # Multi-block case (also exercises the 2-TensorCore split on v7x).
    mask_b = jax.nn.sigmoid(jax.random.normal(k5, (2, 1, 512, 512), jnp.float32))
    gt_mask_b = (jax.random.uniform(k6, (2, 1, 512, 512)) > 0.5).astype(jnp.float32)
    _check(mask_b, gt_mask_b)

    print("KERNEL_OK")
</pallas_src>

<mosaic_0001>
module attributes {stable_mosaic.version = 11 : i64} {
  func.func @kernel(%arg0: i32, %arg1: i32, %arg2: memref<16x128xf32, #tpu.memory_space<vmem>>, %arg3: memref<16x128xi8, #tpu.memory_space<vmem>>, %arg4: memref<1x3x8x128xf32, #tpu.memory_space<vmem>>) attributes {dimension_semantics = [#tpu.dimension_semantics<parallel>, #tpu.dimension_semantics<arbitrary>], iteration_bounds = array<i64: 1, 1>, scalar_prefetch = 0 : i64, scratch_operands = 0 : i64, tpu.core_type = #tpu.core_type<tc>, window_params = [{transform_indices = @transform_0, window_bounds = array<i64: 16, 128>}, {transform_indices = @transform_1, window_bounds = array<i64: 16, 128>}, {transform_indices = @transform_2, window_bounds = array<i64: 1, 3, 8, 128>}]} {
    %c0_i32 = arith.constant 0 : i32
    %0 = arith.cmpi eq, %arg1, %c0_i32 : i32
    %1 = arith.extui %0 : i1 to i32
    %c0_i32_0 = arith.constant 0 : i32
    %2 = arith.cmpi ne, %1, %c0_i32_0 : i32
    scf.if %2 {
      %cst_14 = arith.constant 0.000000e+00 : f32
      %25 = vector.broadcast %cst_14 : f32 to vector<1x3x8x128xf32>
      %c0_15 = arith.constant 0 : index
      %c0_16 = arith.constant 0 : index
      %c0_17 = arith.constant 0 : index
      %c0_18 = arith.constant 0 : index
      %26 = vector.load %arg4[%c0_15, %c0_16, %c0_17, %c0_18] : memref<1x3x8x128xf32, #tpu.memory_space<vmem>>, vector<1x3x8x128xf32>
      tpu.vector_store %arg4[%c0_15, %c0_16, %c0_17, %c0_18], %25 {strides = array<i32>} : memref<1x3x8x128xf32, #tpu.memory_space<vmem>>, vector<1x3x8x128xf32>,
    } else {
    }
    %c0 = arith.constant 0 : index
    %c0_1 = arith.constant 0 : index
    %3 = vector.load %arg2[%c0, %c0_1] : memref<16x128xf32, #tpu.memory_space<vmem>>, vector<16x128xf32>
    %c0_2 = arith.constant 0 : index
    %c0_3 = arith.constant 0 : index
    %4 = vector.load %arg3[%c0_2, %c0_3] : memref<16x128xi8, #tpu.memory_space<vmem>>, vector<16x128xi8>
    %5 = arith.sitofp %4 : vector<16x128xi8> to vector<16x128xf32>
    %c0_4 = arith.constant 0 : index
    %c0_5 = arith.constant 0 : index
    %c0_6 = arith.constant 0 : index
    %c0_7 = arith.constant 0 : index
    %6 = vector.load %arg4[%c0_4, %c0_5, %c0_6, %c0_7] : memref<1x3x8x128xf32, #tpu.memory_space<vmem>>, vector<1x3x8x128xf32>
    %7 = vector.shape_cast %6 : vector<1x3x8x128xf32> to vector<3x8x128xf32>
    %8 = arith.mulf %3, %5 : vector<16x128xf32>
    %9 = vector.shape_cast %8 : vector<16x128xf32> to vector<2x8x128xf32>
    %cst = arith.constant dense<0.000000e+00> : vector<8x128xf32>
    %10 = vector.multi_reduction <add>, %9, %cst [0] : vector<2x8x128xf32> to vector<8x128xf32>
    %11 = arith.mulf %5, %5 : vector<16x128xf32>
    %12 = vector.shape_cast %11 : vector<16x128xf32> to vector<2x8x128xf32>
    %cst_8 = arith.constant dense<0.000000e+00> : vector<8x128xf32>
    %13 = vector.multi_reduction <add>, %12, %cst_8 [0] : vector<2x8x128xf32> to vector<8x128xf32>
    %14 = arith.mulf %3, %3 : vector<16x128xf32>
    %15 = vector.shape_cast %14 : vector<16x128xf32> to vector<2x8x128xf32>
    %cst_9 = arith.constant dense<0.000000e+00> : vector<8x128xf32>
    %16 = vector.multi_reduction <add>, %15, %cst_9 [0] : vector<2x8x128xf32> to vector<8x128xf32>
    %17 = vector.shape_cast %10 : vector<8x128xf32> to vector<1x8x128xf32>
    %18 = vector.shape_cast %13 : vector<8x128xf32> to vector<1x8x128xf32>
    %19 = vector.shape_cast %16 : vector<8x128xf32> to vector<1x8x128xf32>
    %20 = tpu.concatenate %17, %18, %19 in 0 : vector<1x8x128xf32>, vector<1x8x128xf32>, vector<1x8x128xf32> -> vector<3x8x128xf32>
    %21 = arith.addf %7, %20 : vector<3x8x128xf32>
    %c0_10 = arith.constant 0 : index
    %c0_11 = arith.constant 0 : index
    %c0_12 = arith.constant 0 : index
    %c0_13 = arith.constant 0 : index
    %22 = vector.load %arg4[%c0_10, %c0_11, %c0_12, %c0_13] : memref<1x3x8x128xf32, #tpu.memory_space<vmem>>, vector<1x3x8x128xf32>
    %23 = vector.shape_cast %22 : vector<1x3x8x128xf32> to vector<3x8x128xf32>
    %24 = vector.shape_cast %21 : vector<3x8x128xf32> to vector<1x3x8x128xf32>
    tpu.vector_store %arg4[%c0_10, %c0_11, %c0_12, %c0_13], %24 {strides = array<i32>} : memref<1x3x8x128xf32, #tpu.memory_space<vmem>>, vector<1x3x8x128xf32>,
    return
  }
  func.func @transform_0(%arg0: i32, %arg1: i32) -> (i32, i32) {
    %c1_i32 = arith.constant 1 : i32
    %0 = arith.muli %arg0, %c1_i32 : i32
    %1 = arith.addi %0, %arg1 : i32
    %c0_i32 = arith.constant 0 : i32
    %2 = arith.minsi %1, %c0_i32 : i32
    %c0_i32_0 = arith.constant 0 : i32
    %c0_i32_1 = arith.constant 0 : i32
    return %2, %c0_i32_0 : i32, i32
  }
  func.func @transform_1(%arg0: i32, %arg1: i32) -> (i32, i32) {
    %c1_i32 = arith.constant 1 : i32
    %0 = arith.muli %arg0, %c1_i32 : i32
    %1 = arith.addi %0, %arg1 : i32
    %c0_i32 = arith.constant 0 : i32
    %2 = arith.minsi %1, %c0_i32 : i32
    %c0_i32_0 = arith.constant 0 : i32
    %c0_i32_1 = arith.constant 0 : i32
    return %2, %c0_i32_0 : i32, i32
  }
  func.func @transform_2(%arg0: i32, %arg1: i32) -> (i32, i32, i32, i32) {
    %c0_i32 = arith.constant 0 : i32
    %c0_i32_0 = arith.constant 0 : i32
    %c0_i32_1 = arith.constant 0 : i32
    %c0_i32_2 = arith.constant 0 : i32
    return %arg0, %c0_i32, %c0_i32_0, %c0_i32_1 : i32, i32, i32, i32
  }
}

</mosaic_0001>

<bundles_post_ra>
// kernel: tpu_custom_call.1
= control target key start
LH: loop header
LB: loop body
LE: loop exit
PB: predicated region body
PF: predicated region fallthrough
CT: control target
= control target key end

     0   :  { %7 = vsyncpa [#allocation3], 0  ;;  %s230_s0 = inlined_call_operand.hbm [shape: f32[16,128], index: 0, kind: input, shape index: {}]   ;;  %s231_s1 = inlined_call_operand.hbm [shape: s8[16,128], index: 1, kind: input, shape index: {}]   ;;  %s232_s2 = inlined_call_operand.hbm [shape: f32[1,3,8,128], index: 2, kind: output, shape index: {}]  }
   0x1   :  { %8 = vsyncpa [#allocation6], 0 }
   0x2   :  { %9 = vsyncpa [#allocation4], 0  ;;  %s193_s9 = smov [#allocation2]  }
   0x3   :  { %s21_s10 = sshll.u32 %s193_s9, 4  ;;  %s22_s10 = int_to_ptr.vmem [resolvable:$true] %s21_s10 }
   0x4   :  { %s135_s11 = scalar_lea.vmem %s22_s10, 256  ;;  %p140_p1 = scmp.lt.s32.totalorder %s22_s10, %s22_s10 }
   0x5   :  { %p136_p0 = scmp.ne.s32.totalorder %s22_s10, %s135_s11  ;;  %p141_p2 = scmp.lt.s32.totalorder %s135_s11, %s135_s11 }
   0x7   :  { %p142_p3 = por %p141_p2, %p140_p1 }
   0x9   :  { %p143_p4 = pnand %p142_p3, %p136_p0 }
   0xb   :  { %146 = shalt.err (!%p143_p4)
}
   0xc   :  { %s194_s12 = smov 128   ;;  %s195_s13 = smov 8  }
   0xd   :  { %27 = dma.hbm_to_vmem [thread:$0]  %s230_s0, 256, %s22_s10, [#allocation3], %s194_s12, %s194_s12, %s195_s13  }
   0xe   :  { %s196_s16 = smov [#allocation5]  }
   0xf   :  { %s39_s17 = sshll.u32 %s196_s16, 4  ;;  %s40_s17 = int_to_ptr.vmem [resolvable:$true] %s39_s17 }
  0x10   :  { %s155_s18 = scalar_lea.vmem %s40_s17, 64  ;;  %p160_p6 = scmp.lt.s32.totalorder %s40_s17, %s40_s17 }
  0x11   :  { %p156_p5 = scmp.ne.s32.totalorder %s40_s17, %s155_s18  ;;  %p161_p7 = scmp.lt.s32.totalorder %s155_s18, %s155_s18 }
  0x13   :  { %p162_p8 = por %p161_p7, %p160_p6 }
  0x15   :  { %p163_p9 = pnand %p162_p8, %p156_p5 }
  0x17   :  { %166 = shalt.err (!%p163_p9)
}
  0x18   :  { %s197_s19 = smov 32   ;;  %s198_s20 = smov 2  }
  0x19   :  { %45 = dma.hbm_to_vmem [thread:$0]  %s231_s1, 64, %s40_s17, [#allocation6], %s197_s19, %s197_s19, %s198_s20  }
  0x1a   :  { %187 = dma.done.wait [#allocation3], 256  }
  0x1b   :  { %188 = vsyncadd [#allocation3], 4294967040 }
  0x1c   :  { %189 = dma.done.wait [#allocation6], 64  }
  0x1d   :  { %190 = vsyncadd [#allocation6], 4294967232  ;;  %v67_v0 = vld [vmem:[#allocation2] sm:$0xff]  ;;  %v68_v1 = vld [vmem:[#allocation2 + $0x8] sm:$0xff]  ;;  %s199_s0 = smov [#allocation7]  }
  0x1e   :  { %v116_v2 = vld [vmem:[#allocation5] sm:$0xf]   ;;  %v84_v5 = vmul.f32 %v67_v0, %v67_v0  ;;  %v85_v6 = vmul.f32 %v68_v1, %v68_v1  ;;  %s98_s1 = sshll.u32 %s199_s0, 4  ;;  %s99_s1 = int_to_ptr.vmem [resolvable:$true] %s98_s1 }
  0x1f   :  { %v117_v3 = vunpack.c.0.s8 %v116_v2  ;;  %v118_v4 = vunpack.c.1.s8 %v116_v2  ;;  %s167_s23 = scalar_lea.vmem %s99_s1, 384  ;;  %p172_p11 = scmp.lt.s32.totalorder %s99_s1, %s99_s1 }
  0x20   :  { %v86_v9 = vadd.f32 %v85_v6, %v84_v5  ;;  %p168_p10 = scmp.ne.s32.totalorder %s99_s1, %s167_s23  ;;  %p173_p12 = scmp.lt.s32.totalorder %s167_s23, %s167_s23 }
  0x21   :  { %v73_v7 = vcvt.s32.f32 %v117_v3  ;;  %v74_v8 = vcvt.s32.f32 %v118_v4 }
  0x22   :  { %92 = vst [vmem:[#allocation7 + $0x10] sm:$0xff] %v86_v9  ;;  %p174_p13 = por %p173_p12, %p172_p11 }
  0x23   :  { %v78_v10 = vmul.f32 %v73_v7, %v67_v0  ;;  %v79_v11 = vmul.f32 %v74_v8, %v68_v1  ;;  %v81_v12 = vmul.f32 %v73_v7, %v73_v7  ;;  %v82_v13 = vmul.f32 %v74_v8, %v74_v8 }
  0x24   :  { %p175_p0 = pnand %p174_p13, %p168_p10 }
  0x25   :  { %v80_v14 = vadd.f32 %v79_v11, %v78_v10  ;;  %v83_v15 = vadd.f32 %v82_v13, %v81_v12 }
  0x27   :  { %90 = vst [vmem:[#allocation7] sm:$0xff] %v80_v14  ;;  %91 = vst [vmem:[#allocation7 + $0x8] sm:$0xff] %v83_v15 }
  0x28   :  { %178 = shalt.err (!%p175_p0)
}
  0x29   :  { %104 = dma.vmem_to_hbm [thread:$0]  %s99_s1, 384, %s232_s2, [#allocation4], %s194_s12, %s194_s12, %s195_s13  }
  0x2a   :  { %191 = dma.done.wait [#allocation4], 384  }
  0x2b   :  { %192 = vsyncadd [#allocation4], 4294966912 }
  0x2c   :  { %108 = vsyncpa [#allocation3], 1 }
  0x2d   :  { %109 = vsyncpa [#allocation6], 1 }
  0x2e   :  { %110 = vsyncpa [#allocation4], 1 }

</bundles_post_ra>
